<compile_context>
chip_gen: v7x
topology: tpu7x:2x2x1
jax: 0.10.0
libtpu: 0.0.40
codegen_flags: <defaults>
</compile_context>

<pallas_src>
import functools

import jax
import jax.numpy as jnp
from jax import lax
from jax.experimental import pallas as pl
from jax.experimental.pallas import tpu as pltpu


def _pick_tile(dim, target, aligns):
    """Largest divisor of `dim` that is a multiple of one of `aligns` (tried in
    order) and <= target; falls back to the full dim (always a legal block)."""
    if dim <= target:
        return dim
    for align in aligns:
        t = (target // align) * align
        while t >= align:
            if dim % t == 0:
                return t
            t -= align
    return dim


# ----------------------------------------------------------------------------
# Kernel 1: tiled dense layer  y = x @ W + b  (bf16 operands, f32 accumulator)
# ----------------------------------------------------------------------------
def _linear_kernel(x_ref, w_ref, b_ref, o_ref, acc_ref):
    @pl.when(pl.program_id(2) == 0)
    def _init():
        acc_ref[...] = jnp.zeros_like(acc_ref)

    acc_ref[...] += jnp.dot(x_ref[...].astype(jnp.bfloat16), w_ref[...],
                            preferred_element_type=jnp.float32)

    @pl.when(pl.program_id(2) == pl.num_programs(2) - 1)
    def _finalize():
        o_ref[...] = (acc_ref[...] + b_ref[...].astype(jnp.float32)
                      ).astype(o_ref.dtype)


def linear(x2d, w_bf16, b_f32, *, out_dtype=None,
           tm_target=512, tn_target=512, tk_target=1024):
    """x2d: (M, Din) f32/bf16, w: (Din, Dout) bf16, b: (Dout,) f32 -> (M, Dout)."""
    M, Din = x2d.shape
    Dout = w_bf16.shape[1]
    out_dtype = out_dtype or x2d.dtype
    tm = _pick_tile(M, tm_target, (8,))
    tn = _pick_tile(Dout, tn_target, (256, 128))   # 256-aligned for v6e/v7x MXU
    tk = _pick_tile(Din, tk_target, (256, 128))
    b2d = b_f32.reshape(1, Dout)
    grid = (M // tm, Dout // tn, Din // tk)
    cost = pl.CostEstimate(
        flops=2 * M * Dout * Din,
        transcendentals=0,
        bytes_accessed=int(M * Din * x2d.dtype.itemsize + Din * Dout * 2
                           + Dout * 4 + M * Dout * jnp.dtype(out_dtype).itemsize))
    return pl.pallas_call(
        _linear_kernel,
        out_shape=jax.ShapeDtypeStruct((M, Dout), out_dtype),
        grid=grid,
        in_specs=[
            pl.BlockSpec((tm, tk), lambda i, j, k: (i, k)),
            pl.BlockSpec((tk, tn), lambda i, j, k: (k, j)),
            pl.BlockSpec((1, tn), lambda i, j, k: (0, j)),
        ],
        out_specs=pl.BlockSpec((tm, tn), lambda i, j, k: (i, j)),
        scratch_shapes=[pltpu.VMEM((tm, tn), jnp.float32)],
        compiler_params=pltpu.CompilerParams(
            dimension_semantics=("parallel", "parallel", "arbitrary"),
            vmem_limit_bytes=64 * 1024 * 1024),
        cost_estimate=cost,
    )(x2d, w_bf16, b2d)


# ----------------------------------------------------------------------------
# Kernel 2: fused Q-projection + multi-head cross-attention (online softmax
# over Nk tiles) + fused output projection.  Lane-dense 'b n (h d)' layout.
# ----------------------------------------------------------------------------
def _attn_kernel(x_ref, kv_ref, wq_ref, bq_ref, wp_ref, bp_ref, o_ref,
                 q_sc, m_sc, l_sc, acc_sc, *, num_heads, head_dim, emb_dim):
    kv_i = pl.program_id(2)

    @pl.when(kv_i == 0)
    def _prologue():
        # Fused Q projection (softmax scale already folded into wq / bq).
        xq = jnp.dot(x_ref[0].astype(jnp.bfloat16), wq_ref[...],
                     preferred_element_type=jnp.float32)
        q_sc[...] = (xq + bq_ref[...].astype(jnp.float32)).astype(jnp.bfloat16)
        m_sc[...] = jnp.full_like(m_sc, -jnp.inf)
        l_sc[...] = jnp.zeros_like(l_sc)
        acc_sc[...] = jnp.zeros_like(acc_sc)

    kv_tile = kv_ref[0]                              # (tkv, 2*Dd) bf16: [K | V]

    for h in range(num_heads):                       # static unroll over heads
        lo, hi = h * head_dim, (h + 1) * head_dim
        qh = q_sc[:, lo:hi]                          # (tq, Dh)  bf16, pre-scaled
        kh = kv_tile[:, lo:hi]                       # (tkv, Dh) bf16
        vh = kv_tile[:, emb_dim + lo:emb_dim + hi]   # (tkv, Dh) bf16
        # QK^T: contract last dims on the MXU (no materialized transpose).
        s = lax.dot_general(qh, kh, (((1,), (1,)), ((), ())),
                            preferred_element_type=jnp.float32)   # (tq, tkv)
        m_prev = m_sc[h]                                           # (tq, 1)
        m_new = jnp.maximum(m_prev, jnp.max(s, axis=-1, keepdims=True))
        alpha = jnp.exp(m_prev - m_new)
        p = jnp.exp(s - m_new)
        # TODO(synk): attention dropout treated as eval-mode identity.
        l_sc[h] = alpha * l_sc[h] + jnp.sum(p, axis=-1, keepdims=True)
        acc_sc[:, lo:hi] = alpha * acc_sc[:, lo:hi] + jnp.dot(
            p.astype(jnp.bfloat16), vh, preferred_element_type=jnp.float32)
        m_sc[h] = m_new

    @pl.when(kv_i == pl.num_programs(2) - 1)
    def _epilogue():
        # Per-head normalization, then fused output projection.
        for h in range(num_heads):
            lo, hi = h * head_dim, (h + 1) * head_dim
            acc_sc[:, lo:hi] = acc_sc[:, lo:hi] * pl.reciprocal(
                l_sc[h], approx=True)
        proj = jnp.dot(acc_sc[...].astype(jnp.bfloat16), wp_ref[...],
                       preferred_element_type=jnp.float32)
        o_ref[0] = (proj + bp_ref[...].astype(jnp.float32)).astype(o_ref.dtype)


def cross_attention(x, kv, wq_s, bq_s, wp, bp, *, num_heads,
                    tq_target=128, tkv_target=512):
    """x: (B, Nq, Dd) f32; kv: (B, Nk, 2*Dd) bf16 (K|V concat); weights bf16."""
    B, Nq, Dd = x.shape
    _, Nk, Dk2 = kv.shape
    head_dim = Dd // num_heads
    tq = _pick_tile(Nq, tq_target, (8,))
    tkv = _pick_tile(Nk, tkv_target, (128, 8))
    bq2d = bq_s.reshape(1, Dd)
    bp2d = bp.reshape(1, Dd)
    kern = functools.partial(_attn_kernel, num_heads=num_heads,
                             head_dim=head_dim, emb_dim=Dd)
    grid = (B, Nq // tq, Nk // tkv)
    cost = pl.CostEstimate(
        flops=int(B * (4 * Nq * Dd * Dd + 4 * Nq * Nk * Dd)),
        transcendentals=int(B * Nq * Nk * num_heads),
        bytes_accessed=int(B * Nq * Dd * 4 + B * Nk * Dk2 * 2
                           + 2 * Dd * Dd * 2 + 2 * Dd * 4 + B * Nq * Dd * 4))
    return pl.pallas_call(
        kern,
        out_shape=jax.ShapeDtypeStruct((B, Nq, Dd), x.dtype),
        grid=grid,
        in_specs=[
            pl.BlockSpec((1, tq, Dd), lambda b, i, k: (b, i, 0)),    # x tile
            pl.BlockSpec((1, tkv, Dk2), lambda b, i, k: (b, k, 0)),  # K|V tile
            pl.BlockSpec((Dd, Dd), lambda b, i, k: (0, 0)),          # wq (resident)
            pl.BlockSpec((1, Dd), lambda b, i, k: (0, 0)),           # bq
            pl.BlockSpec((Dd, Dd), lambda b, i, k: (0, 0)),          # wp (resident)
            pl.BlockSpec((1, Dd), lambda b, i, k: (0, 0)),           # bp
        ],
        out_specs=pl.BlockSpec((1, tq, Dd), lambda b, i, k: (b, i, 0)),
        scratch_shapes=[
            pltpu.VMEM((tq, Dd), jnp.bfloat16),            # projected, scaled Q
            pltpu.VMEM((num_heads, tq, 1), jnp.float32),   # running max / head
            pltpu.VMEM((num_heads, tq, 1), jnp.float32),   # running denom / head
            pltpu.VMEM((tq, Dd), jnp.float32),             # context accumulator
        ],
        compiler_params=pltpu.CompilerParams(
            dimension_semantics=("parallel", "parallel", "arbitrary"),
            vmem_limit_bytes=64 * 1024 * 1024),
        cost_estimate=cost,
    )(x, kv, wq_s, bq2d, wp, bp2d)


# ----------------------------------------------------------------------------
# Module wrapper
# ----------------------------------------------------------------------------
class MultiheadCrossAttentionPallas:
    def __init__(self, enc_emb_dim, dec_emb_dim, num_heads, dropout, key):
        assert dec_emb_dim % num_heads == 0
        self.emb_dim = dec_emb_dim
        self.num_heads = num_heads
        self.dropout = dropout  # eval-mode identity

        def init_linear(k, fan_in, fan_out):
            # nn.Linear default: U(-1/sqrt(fan_in), 1/sqrt(fan_in))
            kw, kb = jax.random.split(k)
            bound = 1.0 / (fan_in ** 0.5)
            w = jax.random.uniform(kw, (fan_in, fan_out), jnp.float32, -bound, bound)
            b = jax.random.uniform(kb, (fan_out,), jnp.float32, -bound, bound)
            return w, b

        kq, kk, kv, kp = jax.random.split(key, 4)
        wq, bq = init_linear(kq, dec_emb_dim, dec_emb_dim)
        wk, bk = init_linear(kk, enc_emb_dim, dec_emb_dim)
        wv, bv = init_linear(kv, enc_emb_dim, dec_emb_dim)
        wp, bp = init_linear(kp, dec_emb_dim, dec_emb_dim)

        # scaling = emb_dim ** 1 / 2 == emb_dim / 2 (faithful to the PyTorch
        # source, python precedence).  Fold 1/scaling into the Q projection.
        inv_scale = 2.0 / float(dec_emb_dim)

        # bf16 weights (MXU operands), f32 biases.
        self.wq = wq.astype(jnp.bfloat16)
        self.bq = bq
        self.wk = wk.astype(jnp.bfloat16)
        self.bk = bk
        self.wv = wv.astype(jnp.bfloat16)
        self.bv = bv
        self.wp = wp.astype(jnp.bfloat16)
        self.bp = bp

        # Kernel-side parameters: scale folded into Q projection; K|V fused so
        # enc_output is read from HBM once and projected in a single matmul.
        self.wq_scaled = (self.wq.astype(jnp.float32) * inv_scale
                          ).astype(jnp.bfloat16)
        self.bq_scaled = bq * inv_scale
        self.w_kv = jnp.concatenate([self.wk, self.wv], axis=1)   # (De, 2*Dd)
        self.b_kv = jnp.concatenate([bk, bv], axis=0)             # (2*Dd,)

    def __call__(self, x, enc_output):
        B, Nq, Dd = x.shape
        _, Nk, De = enc_output.shape

        # Fused K|V projection; output kept in bf16 for the attention MXU.
        kv = linear(enc_output.reshape(B * Nk, De), self.w_kv, self.b_kv,
                    out_dtype=jnp.bfloat16).reshape(B, Nk, 2 * Dd)

        # Fused Q-proj + multi-head attention (online softmax over Nk tiles)
        # + output projection, lane-dense layout.
        return cross_attention(x, kv, self.wq_scaled, self.bq_scaled,
                               self.wp, self.bp, num_heads=self.num_heads)


# ----------------------------------------------------------------------------
# Pure-JAX reference (mirrors the PyTorch module, using the bf16 weights)
# ----------------------------------------------------------------------------
def _reference(module, x, enc_output):
    B, Nq, Dd = x.shape
    H = module.num_heads
    Dh = Dd // H
    f32 = jnp.float32
    q = x @ module.wq.astype(f32) + module.bq
    k = enc_output @ module.wk.astype(f32) + module.bk
    v = enc_output @ module.wv.astype(f32) + module.bv
    qh = q.reshape(B, Nq, H, Dh).transpose(0, 2, 1, 3)
    kh = k.reshape(B, -1, H, Dh).transpose(0, 2, 1, 3)
    vh = v.reshape(B, -1, H, Dh).transpose(0, 2, 1, 3)
    energy = jnp.einsum('bhqd,bhkd->bhqk', qh, kh)
    scaling = float(module.emb_dim) ** 1 / 2      # == emb_dim / 2
    att = jax.nn.softmax(energy / scaling, axis=-1)
    out = jnp.einsum('bhqk,bhkd->bhqd', att, vh)
    out = out.transpose(0, 2, 1, 3).reshape(B, Nq, Dd)
    return out @ module.wp.astype(f32) + module.bp


if __name__ == "__main__":
    key = jax.random.PRNGKey(0)
    k_param, k_x, k_enc = jax.random.split(key, 3)

    B = 2
    Nq = 8          # decoder sequence length
    Nk = 8          # encoder sequence length
    enc_emb_dim = 32
    dec_emb_dim = 32
    num_heads = 4

    module = MultiheadCrossAttentionPallas(enc_emb_dim, dec_emb_dim,
                                           num_heads, dropout=0.0, key=k_param)

    x = jax.random.normal(k_x, (B, Nq, dec_emb_dim), jnp.float32)
    enc_output = jax.random.normal(k_enc, (B, Nk, enc_emb_dim), jnp.float32)

    out = module(x, enc_output)
    jax.block_until_ready(out)
    assert out.shape == (B, Nq, dec_emb_dim)

    ref = _reference(module, x, enc_output)
    # Tolerance accounts for bf16 MXU operands + approx EUP reciprocal.
    assert jnp.allclose(out, ref, rtol=2e-2, atol=2e-2), "mismatch vs reference"

    print("KERNEL_OK")
</pallas_src>

<mosaic_0001>
module attributes {stable_mosaic.version = 11 : i64} {
  func.func @_linear_kernel(%arg0: i32, %arg1: i32, %arg2: i32, %arg3: memref<16x32xf32, #tpu.memory_space<vmem>>, %arg4: memref<32x64xbf16, #tpu.memory_space<vmem>>, %arg5: memref<1x64xf32, #tpu.memory_space<vmem>>, %arg6: memref<16x64xbf16, #tpu.memory_space<vmem>>, %arg7: memref<16x64xf32, #tpu.memory_space<vmem>>) attributes {dimension_semantics = [#tpu.dimension_semantics<parallel>, #tpu.dimension_semantics<parallel>, #tpu.dimension_semantics<arbitrary>], iteration_bounds = array<i64: 1, 1, 1>, scalar_prefetch = 0 : i64, scratch_operands = 1 : i64, tpu.core_type = #tpu.core_type<tc>, window_params = [{transform_indices = @transform_0, window_bounds = array<i64: 16, 32>}, {transform_indices = @transform_1, window_bounds = array<i64: 32, 64>}, {transform_indices = @transform_2, window_bounds = array<i64: 1, 64>}, {transform_indices = @transform_3, window_bounds = array<i64: 16, 64>}]} {
    %c0_i32 = arith.constant 0 : i32
    %0 = arith.cmpi eq, %arg2, %c0_i32 : i32
    %1 = arith.extui %0 : i1 to i32
    %c0_i32_0 = arith.constant 0 : i32
    %2 = arith.cmpi ne, %1, %c0_i32_0 : i32
    scf.if %2 {
      %cst_10 = arith.constant 0.000000e+00 : f32
      %13 = vector.broadcast %cst_10 : f32 to vector<16x64xf32>
      %c0_11 = arith.constant 0 : index
      %c0_12 = arith.constant 0 : index
      %14 = vector.load %arg7[%c0_11, %c0_12] : memref<16x64xf32, #tpu.memory_space<vmem>>, vector<16x64xf32>
      tpu.vector_store %arg7[%c0_11, %c0_12], %13 {strides = array<i32>} : memref<16x64xf32, #tpu.memory_space<vmem>>, vector<16x64xf32>,
    } else {
    }
    %c0 = arith.constant 0 : index
    %c0_1 = arith.constant 0 : index
    %3 = vector.load %arg7[%c0, %c0_1] : memref<16x64xf32, #tpu.memory_space<vmem>>, vector<16x64xf32>
    %c0_2 = arith.constant 0 : index
    %c0_3 = arith.constant 0 : index
    %4 = vector.load %arg3[%c0_2, %c0_3] : memref<16x32xf32, #tpu.memory_space<vmem>>, vector<16x32xf32>
    %5 = arith.truncf %4 : vector<16x32xf32> to vector<16x32xbf16>
    %c0_4 = arith.constant 0 : index
    %c0_5 = arith.constant 0 : index
    %6 = vector.load %arg4[%c0_4, %c0_5] : memref<32x64xbf16, #tpu.memory_space<vmem>>, vector<32x64xbf16>
    %cst = arith.constant dense<0.000000e+00> : vector<16x64xf32>
    %7 = tpu.matmul %5, %6, %cst {dimension_numbers = #tpu.dot_dimension_numbers<[1], [0], [0], [1], [0, 0, 1, 1], [], []>} : vector<16x32xbf16>, vector<32x64xbf16>, vector<16x64xf32> -> vector<16x64xf32>
    %8 = arith.addf %3, %7 : vector<16x64xf32>
    %c0_6 = arith.constant 0 : index
    %c0_7 = arith.constant 0 : index
    %9 = vector.load %arg7[%c0_6, %c0_7] : memref<16x64xf32, #tpu.memory_space<vmem>>, vector<16x64xf32>
    tpu.vector_store %arg7[%c0_6, %c0_7], %8 {strides = array<i32>} : memref<16x64xf32, #tpu.memory_space<vmem>>, vector<16x64xf32>,
    %c0_i32_8 = arith.constant 0 : i32
    %10 = arith.cmpi eq, %arg2, %c0_i32_8 : i32
    %11 = arith.extui %10 : i1 to i32
    %c0_i32_9 = arith.constant 0 : i32
    %12 = arith.cmpi ne, %11, %c0_i32_9 : i32
    scf.if %12 {
      %c0_10 = arith.constant 0 : index
      %c0_11 = arith.constant 0 : index
      %13 = vector.load %arg7[%c0_10, %c0_11] : memref<16x64xf32, #tpu.memory_space<vmem>>, vector<16x64xf32>
      %c0_12 = arith.constant 0 : index
      %c0_13 = arith.constant 0 : index
      %14 = vector.load %arg5[%c0_12, %c0_13] : memref<1x64xf32, #tpu.memory_space<vmem>>, vector<1x64xf32>
      %15 = vector.broadcast %14 : vector<1x64xf32> to vector<16x64xf32>
      %16 = arith.addf %13, %15 : vector<16x64xf32>
      %17 = arith.truncf %16 : vector<16x64xf32> to vector<16x64xbf16>
      %c0_14 = arith.constant 0 : index
      %c0_15 = arith.constant 0 : index
      %18 = vector.load %arg6[%c0_14, %c0_15] : memref<16x64xbf16, #tpu.memory_space<vmem>>, vector<16x64xbf16>
      tpu.vector_store %arg6[%c0_14, %c0_15], %17 {strides = array<i32>} : memref<16x64xbf16, #tpu.memory_space<vmem>>, vector<16x64xbf16>,
    } else {
    }
    return
  }
  func.func @transform_0(%arg0: i32, %arg1: i32, %arg2: i32) -> (i32, i32) {
    %c0_i32 = arith.constant 0 : i32
    return %arg0, %arg2 : i32, i32
  }
  func.func @transform_1(%arg0: i32, %arg1: i32, %arg2: i32) -> (i32, i32) {
    %c0_i32 = arith.constant 0 : i32
    return %arg2, %arg1 : i32, i32
  }
  func.func @transform_2(%arg0: i32, %arg1: i32, %arg2: i32) -> (i32, i32) {
    %c0_i32 = arith.constant 0 : i32
    %c0_i32_0 = arith.constant 0 : i32
    return %c0_i32, %arg1 : i32, i32
  }
  func.func @transform_3(%arg0: i32, %arg1: i32, %arg2: i32) -> (i32, i32) {
    %c0_i32 = arith.constant 0 : i32
    return %arg0, %arg1 : i32, i32
  }
}

</mosaic_0001>

<bundles_post_ra>
// kernel: tpu_custom_call.1
= control target key start
LH: loop header
LB: loop body
LE: loop exit
PB: predicated region body
PF: predicated region fallthrough
CT: control target
= control target key end

     0   :  { %8 = vsyncpa [#allocation4], 0  ;;  %s389_s0 = inlined_call_operand.hbm [shape: f32[16,32], index: 0, kind: input, shape index: {}]   ;;  %s390_s1 = inlined_call_operand.hbm [shape: bf16[32,64], index: 1, kind: input, shape index: {}]   ;;  %s391_s2 = inlined_call_operand.hbm [shape: f32[1,64], index: 2, kind: input, shape index: {}]   ;;  %s392_s3 = inlined_call_operand.hbm [shape: bf16[16,64], index: 3, kind: output, shape index: {}]  }
   0x1   :  { %9 = vsyncpa [#allocation7], 0 }
   0x2   :  { %10 = vsyncpa [#allocation5], 0  ;;  %s301_s12 = smov [#allocation6]   ;;  %s207_s16 = scalar_lea.hbm %s390_s1, 256 }
   0x3   :  { %s28_s13 = sshll.u32 %s301_s12, 4  ;;  %p208_p0 = scmp.ne.s32.totalorder %s390_s1, %s207_s16  ;;  %s29_s13 = int_to_ptr.vmem [resolvable:$true] %s28_s13 }
   0x4   :  { %p211_p1 = scmp.lt.u32.totalorder %s207_s16, %s390_s1 }
   0x6   :  { %p213_p2 = pnand %p211_p1, %p208_p0 }
   0x8   :  { %216 = shalt.err (!%p213_p2)
}
   0x9   :  { %s217_s21 = scalar_lea.vmem %s29_s13, 256  ;;  %p222_p4 = scmp.lt.s32.totalorder %s29_s13, %s29_s13 }
   0xa   :  { %p218_p3 = scmp.ne.s32.totalorder %s29_s13, %s217_s21  ;;  %p223_p5 = scmp.lt.s32.totalorder %s217_s21, %s217_s21 }
   0xc   :  { %p224_p6 = por %p223_p5, %p222_p4 }
   0xe   :  { %p225_p7 = pnand %p224_p6, %p218_p3 }
  0x10   :  { %228 = shalt.err (!%p225_p7)
}
  0x11   :  { %s302_s22 = smov 64   ;;  %s303_s23 = smov 4  }
  0x12   :  { %34 = dma.hbm_to_vmem [thread:$0]  %s390_s1, 256, %s29_s13, [#allocation7], %s302_s22, %s302_s22, %s303_s23  }
  0x13   :  { %s304_s26 = smov [#allocation3]   ;;  %s229_s30 = scalar_lea.hbm %s389_s0, 256 }
  0x14   :  { %s16_s27 = sshll.u32 %s304_s26, 4  ;;  %p230_p8 = scmp.ne.s32.totalorder %s389_s0, %s229_s30  ;;  %s17_s27 = int_to_ptr.vmem [resolvable:$true] %s16_s27 }
  0x15   :  { %p233_p9 = scmp.lt.u32.totalorder %s229_s30, %s389_s0 }
  0x17   :  { %p235_p10 = pnand %p233_p9, %p230_p8 }
  0x19   :  { %238 = shalt.err (!%p235_p10)
}
  0x1a   :  { %s239_s8 = scalar_lea.vmem %s17_s27, 256  ;;  %p244_p12 = scmp.lt.s32.totalorder %s17_s27, %s17_s27 }
  0x1b   :  { %p240_p11 = scmp.ne.s32.totalorder %s17_s27, %s239_s8  ;;  %p245_p13 = scmp.lt.s32.totalorder %s239_s8, %s239_s8 }
  0x1d   :  { %p246_p0 = por %p245_p13, %p244_p12 }
  0x1f   :  { %p247_p1 = pnand %p246_p0, %p240_p11 }
  0x21   :  { %250 = shalt.err (!%p247_p1)
}
  0x22   :  { %s305_s1 = smov 128   ;;  %s306_s9 = smov 8  }
  0x23   :  { %22 = dma.hbm_to_vmem [thread:$0]  %s389_s0, 256, %s17_s27, [#allocation4], %s305_s1, %s305_s1, %s306_s9  }
  0x24   :  { %s307_s12 = smov [#allocation8]   ;;  %s251_s16 = scalar_lea.hbm %s391_s2, 16 }
  0x25   :  { %s41_s13 = sshll.u32 %s307_s12, 4  ;;  %p252_p2 = scmp.ne.s32.totalorder %s391_s2, %s251_s16  ;;  %s42_s13 = int_to_ptr.vmem [resolvable:$true] %s41_s13 }
  0x26   :  { %p255_p3 = scmp.lt.u32.totalorder %s251_s16, %s391_s2 }
  0x28   :  { %p257_p4 = pnand %p255_p3, %p252_p2 }
  0x2a   :  { %260 = shalt.err (!%p257_p4)
}
  0x2b   :  { %s261_s21 = scalar_lea.vmem %s42_s13, 16  ;;  %s265_s0 = scalar_lea.vmem %s42_s13, 32 }
  0x2c   :  { %p262_p5 = scmp.ne.s32.totalorder %s42_s13, %s261_s21  ;;  %p266_p6 = scmp.lt.s32.totalorder %s42_s13, %s42_s13 }
  0x2d   :  { %p267_p7 = scmp.lt.s32.totalorder %s265_s0, %s261_s21 }
  0x2f   :  { %p268_p8 = por %p267_p7, %p266_p6 }
  0x31   :  { %p269_p9 = pnand %p268_p8, %p262_p5 }
  0x33   :  { %272 = shalt.err (!%p269_p9)
}
  0x34   :  { %44 = dma.hbm_to_vmem [thread:$0]  %s391_s2, 16, %s42_s13, [#allocation7]  }
  0x35   :  { %295 = dma.done.wait [#allocation4], 256  }
  0x36   :  { %296 = vsyncadd [#allocation4], 4294967040 }
  0x37   :  { %297 = dma.done.wait [#allocation7], 272  }
  0x38   :  { %298 = vsyncadd [#allocation7], 4294967024  ;;  %vm59_vm0 = vcmask 523264   ;;  %v308_v0 = vmov 0.0   ;;  %vm309_vm1 = vmmov 0   ;;  %v205_v1 = vld [vmem:[#allocation6] sm:$0xff]  }
  0x39   :  { %60 = vst.msk [vmem:[#allocation2] sm:$0xff] %vm59_vm0, %v308_v0  ;;  %61 = vst.msk [vmem:[#allocation2 + $0x8] sm:$0xff] %vm59_vm0, %v308_v0  ;;  %187 = vmatprep.subr.bf16.mxu0 %v308_v0  ;;  %191 = vmatprep.mubr.msk.bf16.mxu0 %vm309_vm1, %v308_v0  ;;  %v206_v2 = vld [vmem:[#allocation6 + $0x8] sm:$0xff]   ;;  %v64_v3 = vld [vmem:[#allocation3] sm:$0xff]  ;;  %vm83_vm2 = vcmask 261120   ;;  %vm155_vm3 = vcmask 519168  }
  0x3a   :  { %188 = vmatpush3.bf16.msra.mxu0 %v205_v1  ;;  %v65_v4 = vld [vmem:[#allocation3 + $0x8] sm:$0xff]  ;;  %v179_v14 = vld [vmem:[#allocation8] ss:$0 sm:$0xff]  ;;  %s310_s2 = smov [#allocation9]  }
  0x3b   :  { %189 = vmatprep.subr.bf16.mxu0 %v308_v0  ;;  %v66_v5 = vpack.c.bf16 %v65_v4, %v64_v3  ;;  %s163_s26 = sshll.u32 %s310_s2, 4  ;;  %s164_s26 = int_to_ptr.vmem [resolvable:$true] %s163_s26 }
  0x3c   :  { %s273_s27 = scalar_lea.vmem %s164_s26, 128  ;;  %p278_p11 = scmp.lt.s32.totalorder %s164_s26, %s164_s26 }
  0x3d   :  { %p274_p10 = scmp.ne.s32.totalorder %s164_s26, %s273_s27  ;;  %p279_p12 = scmp.lt.s32.totalorder %s273_s27, %s273_s27 }
  0x3e   :  { %190 = vmatpush3.bf16.msra.mxu0 %v206_v2 }
  0x3f   :  { %p280_p13 = por %p279_p12, %p278_p11 }
  0x40   :  { %v62_v6 = vld [vmem:[#allocation2] sm:$0xff]  ;;  %v63_v8 = vld [vmem:[#allocation2 + $0x8] sm:$0xff] }
  0x41   :  { %192 = vmatmul.mubr.msk.bf16.vlgmr.msra.gmra.mrb[0].mxu0 %vm83_vm2, %v66_v5  ;;  %p281_p0 = pnand %p280_p13, %p274_p10 }
 0x114   :  { %v121_v7 = vpop.f32.mrb[0].mxu0 }
 0x115   :  { %v128_v9 = vadd.f32 %v121_v7, %v62_v6  ;;  %v193_v10 = vpop.f32.mrb[1].mxu0 }
 0x116   :  { %v124_v11 = vpop.f32.mrb[2].mxu0 }
 0x117   :  { %131 = vst.msk [vmem:[#allocation2] sm:$0xff] %vm59_vm0, %v128_v9  ;;  %v129_v12 = vadd.f32 %v124_v11, %v63_v8  ;;  %v194_v13 = vpop.f32.mrb[3].mxu0 }
 0x119   :  { %132 = vst.msk [vmem:[#allocation2 + $0x8] sm:$0xff] %vm59_vm0, %v129_v12 }
 0x11e   :  { %v136_v15 = vld [vmem:[#allocation2] sm:$0xff] }
 0x11f   :  { %v145_v16 = vadd.f32 %v179_v14, %v136_v15 }
 0x120   :  { %v137_v17 = vld [vmem:[#allocation2 + $0x8] sm:$0xff] }
 0x121   :  { %v146_v18 = vadd.f32 %v179_v14, %v137_v17  ;;  %v182_v19 = vpack.c.bf16 %v145_v16, %v145_v16 }
 0x123   :  { %v183_v20 = vpack.c.bf16 %v146_v18, %v146_v18  ;;  %156 = vst.msk [vmem:[#allocation9] sm:$0xf] %vm155_vm3, %v182_v19 }
 0x125   :  { %157 = vst.msk [vmem:[#allocation9 + $0x4] sm:$0xf] %vm155_vm3, %v183_v20 }
 0x126   :  { %284 = shalt.err (!%p281_p0)
}
 0x127   :  { %s285_s30 = scalar_lea.hbm %s392_s3, 128 }
 0x128   :  { %p286_p1 = scmp.ne.s32.totalorder %s392_s3, %s285_s30  ;;  %p289_p2 = scmp.lt.u32.totalorder %s285_s30, %s392_s3 }
 0x12a   :  { %p291_p3 = pnand %p289_p2, %p286_p1 }
 0x12c   :  { %294 = shalt.err (!%p291_p3)
}
 0x12d   :  { %169 = dma.vmem_to_hbm [thread:$0]  %s164_s26, 128, %s392_s3, [#allocation5], %s302_s22, %s302_s22, %s303_s23  }
 0x12e   :  { %299 = dma.done.wait [#allocation5], 128  }
 0x12f   :  { %300 = vsyncadd [#allocation5], 4294967168 }
 0x130   :  { %173 = vsyncpa [#allocation4], 1 }
 0x131   :  { %174 = vsyncpa [#allocation7], 1 }
 0x132   :  { %175 = vsyncpa [#allocation5], 1 }

</bundles_post_ra>
